<compile_context>
chip_gen: v5e
topology: v5e:2x2
jax: 0.10.0
libtpu: 0.0.40
codegen_flags: <defaults>
</compile_context>

<pallas_src>
import functools
import math

import jax
import jax.numpy as jnp
from jax import lax
from jax.experimental import pallas as pl
from jax.experimental.pallas import tpu as pltpu


def _round_up(x, m):
    return ((x + m - 1) // m) * m


def _plan_dim(dim, max_tile, align):
    """Pad `dim` to `align`; pick the largest tile <= max_tile (multiple of
    `align`) whose final round-up wastes < 25% of a tile. Returns (padded, tile)."""
    d = _round_up(max(dim, 1), align)
    t = min(max(align, (max_tile // align) * align), d)
    while t > align and _round_up(d, t) - d > t // 4:
        t -= align
    return _round_up(d, t), t


_VMEM_LIMIT = 32 * 1024 * 1024  # explicit scoped-VMEM limit (safe on v5e..v7x)


# ----------------------------------------------------------------------------
# Kernel 1: linear projection  o = x @ w + b  (bf16 in, f32 accum)
# ----------------------------------------------------------------------------
def _linear_bias_kernel(x_ref, w_ref, b_ref, o_ref):
    # Fast path: whole K resident in one block -> no accumulator scratch.
    o_ref[...] = (jnp.dot(x_ref[...], w_ref[...],
                          preferred_element_type=jnp.float32)
                  + b_ref[...]).astype(o_ref.dtype)


def _linear_bias_acc_kernel(x_ref, w_ref, b_ref, o_ref, acc_ref):
    @pl.when(pl.program_id(2) == 0)
    def _():
        acc_ref[...] = jnp.zeros_like(acc_ref)

    acc_ref[...] += jnp.dot(x_ref[...], w_ref[...],
                            preferred_element_type=jnp.float32)

    @pl.when(pl.program_id(2) == pl.num_programs(2) - 1)
    def _():
        o_ref[...] = (acc_ref[...] + b_ref[...]).astype(o_ref.dtype)


def pallas_linear_prepadded(x, w_pad, b_pad, *, tk, tn, tm_max=256):
    """x:[M,K] @ w_pad:[K_pad,N_pad](bf16) + b_pad:[1,N_pad](f32) -> f32 [M_pad,N_pad].

    Weights are pre-padded/pre-cast by the caller (once, in __init__); only the
    activation is cast to bf16 per call, and padded only when M/K require it.
    """
    M, K = x.shape
    K_pad, N_pad = w_pad.shape
    assert K <= K_pad and K_pad % tk == 0 and N_pad % tn == 0

    # M tile: bounded padding waste (shrink tm instead of rounding M far up).
    M_pad = _round_up(max(M, 1), 8)
    tm = max(8, (min(tm_max, M_pad) // 8) * 8)
    while tm > 8 and _round_up(M_pad, tm) - M_pad > tm // 4:
        tm -= 8
    M_pad = _round_up(M_pad, tm)

    xb = x.astype(jnp.bfloat16)
    if (M_pad, K_pad) != (M, K):
        xb = jnp.pad(xb, ((0, M_pad - M), (0, K_pad - K)))

    nk = K_pad // tk
    # TODO(synk): sweep pipeline_mode=pl.Buffered(3) on x/w specs and fp8
    # weights (v7x) once measured on hardware; expected few-% DMA-side wins.

    if nk == 1:
        return pl.pallas_call(
            _linear_bias_kernel,
            out_shape=jax.ShapeDtypeStruct((M_pad, N_pad), jnp.float32),
            grid_spec=pltpu.PrefetchScalarGridSpec(
                num_scalar_prefetch=0,
                grid=(M_pad // tm, N_pad // tn),
                in_specs=[
                    pl.BlockSpec((tm, K_pad), lambda i, j: (i, 0)),
                    pl.BlockSpec((K_pad, tn), lambda i, j: (0, j)),
                    pl.BlockSpec((1, tn), lambda i, j: (0, j)),
                ],
                out_specs=pl.BlockSpec((tm, tn), lambda i, j: (i, j)),
            ),
            compiler_params=pltpu.CompilerParams(
                dimension_semantics=("parallel", "parallel"),
                vmem_limit_bytes=_VMEM_LIMIT),
        )(xb, w_pad, b_pad)

    return pl.pallas_call(
        _linear_bias_acc_kernel,
        out_shape=jax.ShapeDtypeStruct((M_pad, N_pad), jnp.float32),
        grid_spec=pltpu.PrefetchScalarGridSpec(
            num_scalar_prefetch=0,
            grid=(M_pad // tm, N_pad // tn, nk),
            in_specs=[
                pl.BlockSpec((tm, tk), lambda i, j, k: (i, k)),
                pl.BlockSpec((tk, tn), lambda i, j, k: (k, j)),
                pl.BlockSpec((1, tn), lambda i, j, k: (0, j)),
            ],
            out_specs=pl.BlockSpec((tm, tn), lambda i, j, k: (i, j)),
            scratch_shapes=[pltpu.VMEM((tm, tn), jnp.float32)],
        ),
        compiler_params=pltpu.CompilerParams(
            dimension_semantics=("parallel", "parallel", "arbitrary"),
            vmem_limit_bytes=_VMEM_LIMIT),
    )(xb, w_pad, b_pad)


# ----------------------------------------------------------------------------
# Kernel 2: fused text projection + L2 normalization + scaled cosine head,
#           tiled over the class axis.
# ----------------------------------------------------------------------------
def _head_kernel(img_ref, tok_ref, wt_ref, bt_ref, scale_ref,
                 logits_ref, imgn_ref, txtn_ref):
    img = img_ref[...]
    # rsqrt (EUP slot) instead of sqrt+divide; eps guards zero-norm pad rows.
    img_n = img * lax.rsqrt(
        jnp.maximum(jnp.sum(img * img, axis=-1, keepdims=True), 1e-12))

    # Revisited output: write the normalized image features only once.
    @pl.when(pl.program_id(0) == 0)
    def _():
        imgn_ref[...] = img_n

    # Text projection on the MXU (bf16 in, f32 accum) + bias, for this class tile.
    txt = jnp.dot(tok_ref[...], wt_ref[...],
                  preferred_element_type=jnp.float32) + bt_ref[...]
    txt_n = txt * lax.rsqrt(
        jnp.maximum(jnp.sum(txt * txt, axis=-1, keepdims=True), 1e-12))
    txtn_ref[...] = txt_n

    # Fold exp(logit_scale) into the narrow [B, D] image operand (cheaper than
    # scaling the [B, C] logits tile), cast both operands to bf16 for full MXU
    # rate with f32 accumulation, contract over the shared last axis.
    img_q = (img_n * jnp.exp(scale_ref[0])).astype(jnp.bfloat16)
    logits_ref[...] = lax.dot_general(
        img_q, txt_n.astype(jnp.bfloat16),
        dimension_numbers=(((1,), (1,)), ((), ())),
        preferred_element_type=jnp.float32)


def pallas_text_and_head(img_feat_pad, tok_mean, w_txt_pad, b_txt_pad,
                         logit_scale, *, batch, num_classes, embed_dim,
                         c_pad, tc):
    """Returns (logits[B,C], image_features_normed[B,D], text_features_normed[C,D])."""
    B_pad, D_pad = img_feat_pad.shape
    C, T = tok_mean.shape
    T_pad, D_pad2 = w_txt_pad.shape
    assert D_pad2 == D_pad and C == num_classes and c_pad % tc == 0

    tokp = jnp.zeros((c_pad, T_pad), jnp.bfloat16).at[:C, :T].set(
        tok_mean.astype(jnp.bfloat16))

    logits_p, imgn_p, txtn_p = pl.pallas_call(
        _head_kernel,
        out_shape=(
            jax.ShapeDtypeStruct((B_pad, c_pad), jnp.float32),
            jax.ShapeDtypeStruct((B_pad, D_pad), jnp.float32),
            jax.ShapeDtypeStruct((c_pad, D_pad), jnp.float32),
        ),
        grid_spec=pltpu.PrefetchScalarGridSpec(
            num_scalar_prefetch=0,
            grid=(c_pad // tc,),
            in_specs=[
                pl.BlockSpec((B_pad, D_pad), lambda c: (0, 0)),   # image feats (resident)
                pl.BlockSpec((tc, T_pad), lambda c: (c, 0)),      # prompt tokens (class tile)
                pl.BlockSpec((T_pad, D_pad), lambda c: (0, 0)),   # text proj weight (resident)
                pl.BlockSpec((1, D_pad), lambda c: (0, 0)),       # text proj bias (resident)
                pl.BlockSpec(memory_space=pltpu.MemorySpace.SMEM),  # logit_scale scalar
            ],
            out_specs=(
                pl.BlockSpec((B_pad, tc), lambda c: (0, c)),      # logits (class tile)
                pl.BlockSpec((B_pad, D_pad), lambda c: (0, 0)),   # img feats (revisited)
                pl.BlockSpec((tc, D_pad), lambda c: (c, 0)),      # txt feats (class tile)
            ),
        ),
        compiler_params=pltpu.CompilerParams(
            dimension_semantics=("arbitrary",),
            vmem_limit_bytes=_VMEM_LIMIT),
    )(img_feat_pad, tokp, w_txt_pad, b_txt_pad, logit_scale)

    return (logits_p[:batch, :num_classes],
            imgn_p[:batch, :embed_dim],
            txtn_p[:num_classes, :embed_dim])


# ----------------------------------------------------------------------------
# ClipTestTimeTuning (synthetic encoders + Pallas kernels)
# ----------------------------------------------------------------------------
class ClipTestTimeTuningPallas:
    def __init__(self, key, num_classes, img_shape, seq_len,
                 vocab_size=100, tok_dim=64, embed_dim=32,
                 tm=256, tn=256, tk=2048, tc=512):
        C, H, W = img_shape
        in_dim = C * H * W
        k1, k2, k3, k4, k5, k6 = jax.random.split(key, 6)

        # TODO(synk): the real CLIP visual transformer / ResNet backbone is not
        # reproducible without weights; modeled as a single linear projection.
        self.w_img = jax.random.normal(
            k1, (in_dim, embed_dim), jnp.float32) / math.sqrt(in_dim)
        self.b_img = jax.random.normal(k2, (embed_dim,), jnp.float32) * 0.01

        # TODO(synk): the real CLIP text transformer is not reproducible here;
        # modeled as token embedding -> mean pool -> linear projection.
        self.tok_emb = jax.random.normal(
            k3, (vocab_size, tok_dim), jnp.float32) * 0.02
        self.w_txt = jax.random.normal(
            k4, (tok_dim, embed_dim), jnp.float32) / math.sqrt(tok_dim)
        self.b_txt = jax.random.normal(k5, (embed_dim,), jnp.float32) * 0.01

        # Deterministic tokenized prompts (fixed, as in the module's __init__).
        self.prompts = jax.random.randint(
            k6, (num_classes, seq_len), 0, vocab_size, dtype=jnp.int32)

        # CLIP-standard logit_scale init: log(1/0.07).
        self.logit_scale = jnp.array([math.log(1.0 / 0.07)], jnp.float32)
        self.num_classes = num_classes
        self.embed_dim = embed_dim

        # ---- one-time padding / casting / tile planning (feedback: avoid
        # per-call weight pad+cast copies in front of a memory-bound matmul).
        self.k_pad, self.tk = _plan_dim(in_dim, tk, 128)
        self.n_pad, self.tn = _plan_dim(embed_dim, tn, 128)
        self.tm_max = tm
        self.w_img_p = jnp.zeros((self.k_pad, self.n_pad), jnp.bfloat16).at[
            :in_dim, :embed_dim].set(self.w_img.astype(jnp.bfloat16))
        self.b_img_p = jnp.zeros((1, self.n_pad), jnp.float32).at[
            0, :embed_dim].set(self.b_img)

        self.t_pad = _round_up(tok_dim, 128)
        self.c_pad, self.tc = _plan_dim(num_classes, tc, 128)
        self.d_pad = self.n_pad  # head D must match image-kernel output width
        self.w_txt_p = jnp.zeros((self.t_pad, self.d_pad), jnp.bfloat16).at[
            :tok_dim, :embed_dim].set(self.w_txt.astype(jnp.bfloat16))
        self.b_txt_p = jnp.zeros((1, self.d_pad), jnp.float32).at[
            0, :embed_dim].set(self.b_txt)

    @functools.partial(jax.jit, static_argnums=0)
    def forward(self, images):
        # images: [B, C, H, W] (NCHW, matching PyTorch)
        B = images.shape[0]
        x_flat = images.reshape(B, -1).astype(jnp.float32)

        # Image projection: Pallas matmul (fast single-K-block path at these
        # shapes); output stays padded and is consumed directly by the head.
        img_pad = pallas_linear_prepadded(
            x_flat, self.w_img_p, self.b_img_p,
            tk=self.tk, tn=self.tn, tm_max=self.tm_max)

        # Text glue: embedding lookup + mean pool.
        # TODO(synk): gather+mean kept as XLA glue; could move in-kernel via
        # scalar-prefetch indexed DMA if seq_len/num_classes grow.
        tok = jnp.take(self.tok_emb, self.prompts, axis=0)   # [C, L, tok_dim]
        tok_mean = jnp.mean(tok, axis=1)                      # [C, tok_dim]

        # Fused: text projection + L2 norms + exp(logit_scale)*img@txt.T,
        # tiled over the class axis.
        return pallas_text_and_head(
            img_pad, tok_mean, self.w_txt_p, self.b_txt_p, self.logit_scale,
            batch=B, num_classes=self.num_classes, embed_dim=self.embed_dim,
            c_pad=self.c_pad, tc=self.tc)


# ----------------------------------------------------------------------------
if __name__ == "__main__":
    key = jax.random.PRNGKey(0)
    k_model, k_img = jax.random.split(key)

    B, C, H, W = 2, 4, 16, 16
    num_classes, seq_len = 8, 8
    embed_dim = 32

    model = ClipTestTimeTuningPallas(
        k_model, num_classes=num_classes, img_shape=(C, H, W),
        seq_len=seq_len, embed_dim=embed_dim)

    images = jax.random.normal(k_img, (B, C, H, W), jnp.float32)

    logits, image_features, text_features = model.forward(images)
    jax.block_until_ready((logits, image_features, text_features))

    # Pure-JAX reference using the same bf16-in / f32-accum matmul recipe.
    x_flat = images.reshape(B, -1)
    img_f = jnp.dot(x_flat.astype(jnp.bfloat16),
                    model.w_img.astype(jnp.bfloat16),
                    preferred_element_type=jnp.float32) + model.b_img
    tok_mean = jnp.mean(jnp.take(model.tok_emb, model.prompts, axis=0), axis=1)
    txt_f = jnp.dot(tok_mean.astype(jnp.bfloat16),
                    model.w_txt.astype(jnp.bfloat16),
                    preferred_element_type=jnp.float32) + model.b_txt
    img_n = img_f / jnp.linalg.norm(img_f, axis=1, keepdims=True)
    txt_n = txt_f / jnp.linalg.norm(txt_f, axis=1, keepdims=True)
    scale = jnp.exp(model.logit_scale[0])
    ref_logits = jnp.dot((img_n * scale).astype(jnp.bfloat16),
                         txt_n.astype(jnp.bfloat16).T,
                         preferred_element_type=jnp.float32)

    assert logits.shape == (B, num_classes)
    assert image_features.shape == (B, embed_dim)
    assert text_features.shape == (num_classes, embed_dim)
    assert jnp.allclose(image_features, img_n, atol=2e-3, rtol=2e-3)
    assert jnp.allclose(text_features, txt_n, atol=2e-3, rtol=2e-3)
    assert jnp.allclose(logits, ref_logits, atol=5e-3, rtol=5e-3)

    print("KERNEL_OK")
</pallas_src>

<mosaic_0001>
module attributes {stable_mosaic.version = 11 : i64} {
  func.func @_linear_bias_kernel(%arg0: i32, %arg1: i32, %arg2: memref<8x1024xbf16, #tpu.memory_space<vmem>>, %arg3: memref<1024x128xbf16, #tpu.memory_space<vmem>>, %arg4: memref<1x128xf32, #tpu.memory_space<vmem>>, %arg5: memref<8x128xf32, #tpu.memory_space<vmem>>) attributes {dimension_semantics = [#tpu.dimension_semantics<parallel>, #tpu.dimension_semantics<parallel>], iteration_bounds = array<i64: 1, 1>, scalar_prefetch = 0 : i64, scratch_operands = 0 : i64, tpu.core_type = #tpu.core_type<tc>, window_params = [{transform_indices = @transform_0, window_bounds = array<i64: 8, 1024>}, {transform_indices = @transform_1, window_bounds = array<i64: 1024, 128>}, {transform_indices = @transform_2, window_bounds = array<i64: 1, 128>}, {transform_indices = @transform_3, window_bounds = array<i64: 8, 128>}]} {
    %c0 = arith.constant 0 : index
    %c0_0 = arith.constant 0 : index
    %0 = vector.load %arg2[%c0, %c0_0] : memref<8x1024xbf16, #tpu.memory_space<vmem>>, vector<8x1024xbf16>
    %c0_1 = arith.constant 0 : index
    %c0_2 = arith.constant 0 : index
    %1 = vector.load %arg3[%c0_1, %c0_2] : memref<1024x128xbf16, #tpu.memory_space<vmem>>, vector<1024x128xbf16>
    %cst = arith.constant dense<0.000000e+00> : vector<8x128xf32>
    %2 = tpu.matmul %0, %1, %cst {dimension_numbers = #tpu.dot_dimension_numbers<[1], [0], [0], [1], [0, 0, 1, 1], [], []>} : vector<8x1024xbf16>, vector<1024x128xbf16>, vector<8x128xf32> -> vector<8x128xf32>
    %c0_3 = arith.constant 0 : index
    %c0_4 = arith.constant 0 : index
    %3 = vector.load %arg4[%c0_3, %c0_4] : memref<1x128xf32, #tpu.memory_space<vmem>>, vector<1x128xf32>
    %4 = vector.broadcast %3 : vector<1x128xf32> to vector<8x128xf32>
    %5 = arith.addf %2, %4 : vector<8x128xf32>
    %c0_5 = arith.constant 0 : index
    %c0_6 = arith.constant 0 : index
    %6 = vector.load %arg5[%c0_5, %c0_6] : memref<8x128xf32, #tpu.memory_space<vmem>>, vector<8x128xf32>
    tpu.vector_store %arg5[%c0_5, %c0_6], %5 {strides = array<i32>} : memref<8x128xf32, #tpu.memory_space<vmem>>, vector<8x128xf32>,
    return
  }
  func.func @transform_0(%arg0: i32, %arg1: i32) -> (i32, i32) {
    %c0_i32 = arith.constant 0 : i32
    %c0_i32_0 = arith.constant 0 : i32
    return %arg0, %c0_i32 : i32, i32
  }
  func.func @transform_1(%arg0: i32, %arg1: i32) -> (i32, i32) {
    %c0_i32 = arith.constant 0 : i32
    %c0_i32_0 = arith.constant 0 : i32
    return %c0_i32, %arg1 : i32, i32
  }
  func.func @transform_2(%arg0: i32, %arg1: i32) -> (i32, i32) {
    %c0_i32 = arith.constant 0 : i32
    %c0_i32_0 = arith.constant 0 : i32
    return %c0_i32, %arg1 : i32, i32
  }
  func.func @transform_3(%arg0: i32, %arg1: i32) -> (i32, i32) {
    %c0_i32 = arith.constant 0 : i32
    return %arg0, %arg1 : i32, i32
  }
}

module attributes {stable_mosaic.version = 11 : i64} {
  func.func @_head_kernel(%arg0: i32, %arg1: memref<8x128xf32, #tpu.memory_space<vmem>>, %arg2: memref<128x128xbf16, #tpu.memory_space<vmem>>, %arg3: memref<128x128xbf16, #tpu.memory_space<vmem>>, %arg4: memref<1x128xf32, #tpu.memory_space<vmem>>, %arg5: memref<1xf32, #tpu.memory_space<smem>>, %arg6: memref<8x128xf32, #tpu.memory_space<vmem>>, %arg7: memref<8x128xf32, #tpu.memory_space<vmem>>, %arg8: memref<128x128xf32, #tpu.memory_space<vmem>>) attributes {dimension_semantics = [#tpu.dimension_semantics<arbitrary>], iteration_bounds = array<i64: 1>, scalar_prefetch = 0 : i64, scratch_operands = 0 : i64, tpu.core_type = #tpu.core_type<tc>, window_params = [{pipeline_mode = #tpu.pipeline_mode<synchronous>, transform_indices = @transform_0, window_bounds = array<i64: 8, 128>}, {transform_indices = @transform_1, window_bounds = array<i64: 128, 128>}, {pipeline_mode = #tpu.pipeline_mode<synchronous>, transform_indices = @transform_2, window_bounds = array<i64: 128, 128>}, {pipeline_mode = #tpu.pipeline_mode<synchronous>, transform_indices = @transform_3, window_bounds = array<i64: 1, 128>}, {transform_indices = @transform_4, window_bounds = array<i64: 1>}, {transform_indices = @transform_5, window_bounds = array<i64: 8, 128>}, {pipeline_mode = #tpu.pipeline_mode<synchronous>, transform_indices = @transform_6, window_bounds = array<i64: 8, 128>}, {transform_indices = @transform_7, window_bounds = array<i64: 128, 128>}]} {
    %c0 = arith.constant 0 : index
    %c0_0 = arith.constant 0 : index
    %0 = vector.load %arg1[%c0, %c0_0] : memref<8x128xf32, #tpu.memory_space<vmem>>, vector<8x128xf32>
    %1 = arith.mulf %0, %0 : vector<8x128xf32>
    %cst = arith.constant dense<0.000000e+00> : vector<8xf32>
    %2 = vector.multi_reduction <add>, %1, %cst [1] : vector<8x128xf32> to vector<8xf32>
    %3 = vector.shape_cast %2 : vector<8xf32> to vector<8x1xf32>
    %cst_1 = arith.constant 9.99999996E-13 : f32
    %4 = vector.broadcast %cst_1 : f32 to vector<8x1xf32>
    %5 = arith.maximumf %3, %4 : vector<8x1xf32>
    %6 = math.rsqrt %5 : vector<8x1xf32>
    %7 = vector.broadcast %6 : vector<8x1xf32> to vector<8x128xf32>
    %8 = arith.mulf %0, %7 : vector<8x128xf32>
    %c0_i32 = arith.constant 0 : i32
    %9 = arith.cmpi eq, %arg0, %c0_i32 : i32
    %10 = arith.extui %9 : i1 to i32
    %c0_i32_2 = arith.constant 0 : i32
    %11 = arith.cmpi ne, %10, %c0_i32_2 : i32
    scf.if %11 {
      %c0_18 = arith.constant 0 : index
      %c0_19 = arith.constant 0 : index
      %35 = vector.load %arg7[%c0_18, %c0_19] : memref<8x128xf32, #tpu.memory_space<vmem>>, vector<8x128xf32>
      tpu.vector_store %arg7[%c0_18, %c0_19], %8 {strides = array<i32>} : memref<8x128xf32, #tpu.memory_space<vmem>>, vector<8x128xf32>,
    } else {
    }
    %c0_3 = arith.constant 0 : index
    %c0_4 = arith.constant 0 : index
    %12 = vector.load %arg2[%c0_3, %c0_4] : memref<128x128xbf16, #tpu.memory_space<vmem>>, vector<128x128xbf16>
    %c0_5 = arith.constant 0 : index
    %c0_6 = arith.constant 0 : index
    %13 = vector.load %arg3[%c0_5, %c0_6] : memref<128x128xbf16, #tpu.memory_space<vmem>>, vector<128x128xbf16>
    %cst_7 = arith.constant dense<0.000000e+00> : vector<128x128xf32>
    %14 = tpu.matmul %12, %13, %cst_7 {dimension_numbers = #tpu.dot_dimension_numbers<[1], [0], [0], [1], [0, 0, 1, 1], [], []>} : vector<128x128xbf16>, vector<128x128xbf16>, vector<128x128xf32> -> vector<128x128xf32>
    %c0_8 = arith.constant 0 : index
    %c0_9 = arith.constant 0 : index
    %15 = vector.load %arg4[%c0_8, %c0_9] : memref<1x128xf32, #tpu.memory_space<vmem>>, vector<1x128xf32>
    %16 = vector.broadcast %15 : vector<1x128xf32> to vector<128x128xf32>
    %17 = arith.addf %14, %16 : vector<128x128xf32>
    %18 = arith.mulf %17, %17 : vector<128x128xf32>
    %cst_10 = arith.constant dense<0.000000e+00> : vector<128xf32>
    %19 = vector.multi_reduction <add>, %18, %cst_10 [1] : vector<128x128xf32> to vector<128xf32>
    %20 = vector.shape_cast %19 : vector<128xf32> to vector<128x1xf32>
    %cst_11 = arith.constant 9.99999996E-13 : f32
    %21 = vector.broadcast %cst_11 : f32 to vector<128x1xf32>
    %22 = arith.maximumf %20, %21 : vector<128x1xf32>
    %23 = math.rsqrt %22 : vector<128x1xf32>
    %24 = vector.broadcast %23 : vector<128x1xf32> to vector<128x128xf32>
    %25 = arith.mulf %17, %24 : vector<128x128xf32>
    %c0_12 = arith.constant 0 : index
    %c0_13 = arith.constant 0 : index
    %26 = vector.load %arg8[%c0_12, %c0_13] : memref<128x128xf32, #tpu.memory_space<vmem>>, vector<128x128xf32>
    tpu.vector_store %arg8[%c0_12, %c0_13], %25 {strides = array<i32>} : memref<128x128xf32, #tpu.memory_space<vmem>>, vector<128x128xf32>,
    %c0_14 = arith.constant 0 : index
    %27 = memref.load %arg5[%c0_14] : memref<1xf32, #tpu.memory_space<smem>>
    %28 = math.exp %27 : f32
    %29 = vector.broadcast %28 : f32 to vector<8x128xf32>
    %30 = arith.mulf %8, %29 : vector<8x128xf32>
    %31 = arith.truncf %30 : vector<8x128xf32> to vector<8x128xbf16>
    %32 = arith.truncf %25 : vector<128x128xf32> to vector<128x128xbf16>
    %cst_15 = arith.constant dense<0.000000e+00> : vector<8x128xf32>
    %33 = tpu.matmul %31, %32, %cst_15 {dimension_numbers = #tpu.dot_dimension_numbers<[1], [1], [0], [0], [0, 0, 1, 0], [], []>} : vector<8x128xbf16>, vector<128x128xbf16>, vector<8x128xf32> -> vector<8x128xf32>
    %c0_16 = arith.constant 0 : index
    %c0_17 = arith.constant 0 : index
    %34 = vector.load %arg6[%c0_16, %c0_17] : memref<8x128xf32, #tpu.memory_space<vmem>>, vector<8x128xf32>
    tpu.vector_store %arg6[%c0_16, %c0_17], %33 {strides = array<i32>} : memref<8x128xf32, #tpu.memory_space<vmem>>, vector<8x128xf32>,
    return
  }
  func.func @transform_0(%arg0: i32) -> (i32, i32) {
    %c0_i32 = arith.constant 0 : i32
    %c0_i32_0 = arith.constant 0 : i32
    %c0_i32_1 = arith.constant 0 : i32
    return %c0_i32, %c0_i32_0 : i32, i32
  }
  func.func @transform_1(%arg0: i32) -> (i32, i32) {
    %c0_i32 = arith.constant 0 : i32
    %c0_i32_0 = arith.constant 0 : i32
    return %arg0, %c0_i32 : i32, i32
  }
  func.func @transform_2(%arg0: i32) -> (i32, i32) {
    %c0_i32 = arith.constant 0 : i32
    %c0_i32_0 = arith.constant 0 : i32
    %c0_i32_1 = arith.constant 0 : i32
    return %c0_i32, %c0_i32_0 : i32, i32
  }
  func.func @transform_3(%arg0: i32) -> (i32, i32) {
    %c0_i32 = arith.constant 0 : i32
    %c0_i32_0 = arith.constant 0 : i32
    %c0_i32_1 = arith.constant 0 : i32
    return %c0_i32, %c0_i32_0 : i32, i32
  }
  func.func @transform_4(%arg0: i32) -> i32 {
    %c0_i32 = arith.constant 0 : i32
    %c0_i32_0 = arith.constant 0 : i32
    return %c0_i32 : i32
  }
  func.func @transform_5(%arg0: i32) -> (i32, i32) {
    %c0_i32 = arith.constant 0 : i32
    %c0_i32_0 = arith.constant 0 : i32
    return %c0_i32, %arg0 : i32, i32
  }
  func.func @transform_6(%arg0: i32) -> (i32, i32) {
    %c0_i32 = arith.constant 0 : i32
    %c0_i32_0 = arith.constant 0 : i32
    %c0_i32_1 = arith.constant 0 : i32
    return %c0_i32, %c0_i32_0 : i32, i32
  }
  func.func @transform_7(%arg0: i32) -> (i32, i32) {
    %c0_i32 = arith.constant 0 : i32
    %c0_i32_0 = arith.constant 0 : i32
    return %arg0, %c0_i32 : i32, i32
  }
}

</mosaic_0001>

<bundles_post_ra>
// kernel: forward.3
= control target key start
LH: loop header
LB: loop body
LE: loop exit
PB: predicated region body
PF: predicated region fallthrough
CT: control target
= control target key end

     0   :  { %s1148_s2 = inlined_call_operand.vmem [shape: bf16[128,128], index: 2, kind: input, shape index: {}]   ;;  %s1149_s3 = inlined_call_operand.vmem [shape: f32[1,128], index: 3, kind: input, shape index: {}]   ;;  %s1150_s1 = inlined_call_operand.vmem [shape: bf16[128,128], index: 1, kind: input, shape index: {}]   ;;  %s1151_s0 = inlined_call_operand.vmem [shape: f32[8,128], index: 0, kind: input, shape index: {}]   ;;  %s1152_s4 = inlined_call_operand.<no memory space> [shape: f32[1], index: 4, kind: input, shape index: {}]   ;;  %s1153_s7 = inlined_call_operand.vmem [shape: f32[128,128], index: 7, kind: output, shape index: {2}]   ;;  %s1154_s6 = inlined_call_operand.vmem [shape: f32[8,128], index: 6, kind: output, shape index: {1}]   ;;  %s1155_s5 = inlined_call_operand.vmem [shape: f32[8,128], index: 5, kind: output, shape index: {0}]  }
   0x1   :  { %v603_v0 = vld [vmem:[%s1148_s2 + $0x38] sm:$0xff]  ;;  %v602_v1 = vld [vmem:[%s1148_s2 + $0x30] sm:$0xff]  ;;  %v601_v2 = vld [vmem:[%s1148_s2 + $0x28] sm:$0xff] }
   0x2   :  { %604 = vmatpush.bf16.msra.mxu2 %v603_v0  ;;  %605 = vmatpush.bf16.msra.mxu3 %v603_v0  ;;  %v600_v3 = vld [vmem:[%s1148_s2 + $0x20] sm:$0xff]  ;;  %v599_v4 = vld [vmem:[%s1148_s2 + $0x18] sm:$0xff]  ;;  %v598_v5 = vld [vmem:[%s1148_s2 + $0x10] sm:$0xff] }
   0x3   :  { %177 = vmatpush.bf16.msra.mxu0 %v603_v0  ;;  %v597_v6 = vld [vmem:[%s1148_s2 + $0x8] sm:$0xff]  ;;  %v596_v7 = vld [vmem:[%s1148_s2] sm:$0xff]  ;;  %v591_v8 = vld [vmem:[%s1150_s1 + $0x18] sm:$0xff] }
   0x4   :  { %v594_v9 = vld [vmem:[%s1150_s1 + $0x30] sm:$0xff]  ;;  %v588_v10 = vld [vmem:[%s1150_s1] sm:$0xff]  ;;  %v595_v12 = vld [vmem:[%s1150_s1 + $0x38] sm:$0xff] }
   0x5   :  { %v592_v11 = vld [vmem:[%s1150_s1 + $0x20] sm:$0xff]  ;;  %v589_v13 = vld [vmem:[%s1150_s1 + $0x8] sm:$0xff]  ;;  %v590_v15 = vld [vmem:[%s1150_s1 + $0x10] sm:$0xff] }
   0x6   :  { %606 = vmatpush.bf16.msra.mxu2 %v602_v1  ;;  %607 = vmatpush.bf16.msra.mxu3 %v602_v1  ;;  %v593_v14 = vld [vmem:[%s1150_s1 + $0x28] sm:$0xff]  ;;  %v752_v17 = vld [vmem:[%s1149_s3] ss:$0 sm:$0xff] }
   0x7   :  { %178 = vmatpush.bf16.msra.mxu0 %v602_v1  ;;  %v818_v56 = vld [vmem:[%s1151_s0] sm:$0xff] }
   0x8   :  { %v25_v58 = vmul.f32 %v818_v56, %v818_v56 }
   0xa   :  { %608 = vmatpush.bf16.msra.mxu2 %v601_v2  ;;  %609 = vmatpush.bf16.msra.mxu3 %v601_v2 }
   0xb   :  { %179 = vmatpush.bf16.msra.mxu0 %v601_v2 }
   0xe   :  { %610 = vmatpush.bf16.msra.mxu2 %v600_v3  ;;  %611 = vmatpush.bf16.msra.mxu3 %v600_v3 }
   0xf   :  { %180 = vmatpush.bf16.msra.mxu0 %v600_v3 }
  0x12   :  { %612 = vmatpush.bf16.msra.mxu2 %v599_v4  ;;  %613 = vmatpush.bf16.msra.mxu3 %v599_v4 }
  0x13   :  { %181 = vmatpush.bf16.msra.mxu0 %v599_v4 }
  0x16   :  { %614 = vmatpush.bf16.msra.mxu2 %v598_v5  ;;  %615 = vmatpush.bf16.msra.mxu3 %v598_v5 }
  0x17   :  { %182 = vmatpush.bf16.msra.mxu0 %v598_v5  ;;  %v483_v5 = vstv %s1152_s4 }
  0x1a   :  { %616 = vmatpush.bf16.msra.mxu2 %v597_v6  ;;  %617 = vmatpush.bf16.msra.mxu3 %v597_v6 }
  0x1b   :  { %183 = vmatpush.bf16.msra.mxu0 %v597_v6  ;;  %v484_v6 = vmul.f32 1.442695, %v483_v5 }
  0x1e   :  { %618 = vmatpush.bf16.msra.mxu2 %v596_v7  ;;  %619 = vmatpush.bf16.msra.mxu3 %v596_v7 }
  0x1f   :  { %184 = vmatpush.bf16.msra.mxu0 %v596_v7 }
  0x21   :  { %200 = vmatmul.bf16.vlgmr.msra.gmra.mxu2 %v591_v8  ;;  %215 = vmatmul.bf16.vlgmr.msra.gmra.mxu3 %v594_v9 }
  0x22   :  { %185 = vmatmul.bf16.vlgmr.msra.gmra.mxu0 %v588_v10 }
  0x31   :  { %205 = vmatmul.bf16.gmra.mxu2 %v592_v11  ;;  %220 = vmatmul.bf16.gmra.mxu3 %v595_v12 }
  0x32   :  { %190 = vmatmul.bf16.gmra.mxu0 %v589_v13 }
  0x41   :  { %210 = vmatmul.bf16.gmra.mxu2 %v593_v14 }
  0x42   :  { %195 = vmatmul.bf16.gmra.mxu0 %v590_v15 }
  0x9f   :  { %v747_v16 = vpop.f32.mrf.mxu0 }
  0xa0   :  { %v838_v1 = vadd.f32 %v752_v17, %v747_v16 }
  0xa2   :  { %v226_v2 = vmul.f32 %v838_v1, %v838_v1 }
  0xa4   :  { %v201_v18 = vpop.f32.mrf.mxu2  ;;  %v216_v19 = vpop.f32.mrf.mxu3 }
  0xa5   :  { %v755_v20 = vadd.f32 %v752_v17, %v216_v19  ;;  %v810_v54 = vadd.f32 %v752_v17, %v201_v18 }
  0xa7   :  { %v238_v21 = vmul.f32 %v755_v20, %v755_v20  ;;  %v188_v22 = vpop.f32.mrf.mxu0  ;;  %v232_v59 = vmul.f32 %v810_v54, %v810_v54 }
  0xa8   :  { %v830_v62 = vadd.f32 %v752_v17, %v188_v22 }
  0xa9   :  { %266 = vadd.xlane.f32.xlu1 %v238_v21 }
  0xaa   :  { %v227_v0 = vmul.f32 %v830_v62, %v830_v62 }
  0xac   :  { %v203_v23 = vpop.f32.mrf.mxu2  ;;  %v218_v24 = vpop.f32.mrf.mxu3 }
  0xad   :  { %v760_v25 = vadd.f32 %v752_v17, %v218_v24  ;;  %v798_v48 = vadd.f32 %v752_v17, %v203_v23 }
  0xaf   :  { %v239_v26 = vmul.f32 %v760_v25, %v760_v25  ;;  %v191_v27 = vpop.f32.mrf.mxu0  ;;  %v233_v53 = vmul.f32 %v798_v48, %v798_v48 }
  0xb0   :  { %v813_v55 = vadd.f32 %v752_v17, %v191_v27 }
  0xb1   :  { %268 = vadd.xlane.f32.xlu1 %v239_v26 }
  0xb2   :  { %v228_v60 = vmul.f32 %v813_v55, %v813_v55 }
  0xb4   :  { %v206_v28 = vpop.f32.mrf.mxu2  ;;  %v221_v29 = vpop.f32.mrf.mxu3 }
  0xb5   :  { %v765_v30 = vadd.f32 %v752_v17, %v221_v29  ;;  %v783_v41 = vadd.f32 %v752_v17, %v206_v28 }
  0xb7   :  { %v240_v31 = vmul.f32 %v765_v30, %v765_v30  ;;  %v193_v32 = vpop.f32.mrf.mxu0  ;;  %v234_v46 = vmul.f32 %v783_v41, %v783_v41 }
  0xb8   :  { %v795_v47 = vadd.f32 %v752_v17, %v193_v32 }
  0xb9   :  { %270 = vadd.xlane.f32.xlu0 %v240_v31 }
  0xba   :  { %v229_v51 = vmul.f32 %v795_v47, %v795_v47 }
  0xbc   :  { %v208_v33 = vpop.f32.mrf.mxu2  ;;  %v223_v34 = vpop.f32.mrf.mxu3 }
  0xbd   :  { %v770_v35 = vadd.f32 %v752_v17, %v208_v33  ;;  %v773_v36 = vadd.f32 %v752_v17, %v223_v34 }
  0xbf   :  { %v241_v37 = vmul.f32 %v773_v36, %v773_v36  ;;  %v235_v38 = vmul.f32 %v770_v35, %v770_v35  ;;  %v196_v39 = vpop.f32.mrf.mxu0 }
  0xc0   :  { %v780_v40 = vadd.f32 %v752_v17, %v196_v39 }
  0xc1   :  { %272 = vadd.xlane.f32.xlu0 %v241_v37  ;;  %260 = vadd.xlane.f32.xlu1 %v235_v38 }
  0xc2   :  { %v230_v44 = vmul.f32 %v780_v40, %v780_v40 }
  0xc4   :  { %v211_v42 = vpop.f32.mrf.mxu2 }
  0xc5   :  { %v786_v43 = vadd.f32 %v752_v17, %v211_v42 }
  0xc7   :  { %v236_v45 = vmul.f32 %v786_v43, %v786_v43  ;;  %v198_v57 = vpop.f32.mrf.mxu0 }
  0xc8   :  { %v827_v61 = vadd.f32 %v752_v17, %v198_v57 }
  0xc9   :  { %262 = vadd.xlane.f32.xlu2 %v236_v45  ;;  %258 = vadd.xlane.f32.xlu0 %v234_v46 }
  0xca   :  { %250 = vadd.xlane.f32.xlu1 %v230_v44  ;;  %v231_v63 = vmul.f32 %v827_v61, %v827_v61 }
  0xcc   :  { %v213_v49 = vpop.f32.mrf.mxu2 }
  0xcd   :  { %v801_v50 = vadd.f32 %v752_v17, %v213_v49 }
  0xcf   :  { %v237_v52 = vmul.f32 %v801_v50, %v801_v50 }
  0xd1   :  { %264 = vadd.xlane.f32.xlu2 %v237_v52  ;;  %256 = vadd.xlane.f32.xlu0 %v233_v53 }
  0xd2   :  { %248 = vadd.xlane.f32.xlu1 %v229_v51 }
  0xd9   :  { %254 = vadd.xlane.f32.xlu2 %v232_v59  ;;  %246 = vadd.xlane.f32.xlu0 %v228_v60 }
  0xda   :  { %26 = vadd.xlane.f32.xlu1 %v25_v58 }
  0xe1   :  { %252 = vadd.xlane.f32.xlu2 %v231_v63  ;;  %244 = vadd.xlane.f32.xlu0 %v227_v0 }
  0xe9   :  { %242 = vadd.xlane.f32.xlu2 %v226_v2 }
 0x11c   :  { %v267_v3 = vpop.xlane.xlu1 %266 }
 0x11d   :  { %v286_v4 = vmax.f32 %v267_v3, 1e-12 }
 0x11f   :  { %623 = vrsqrt.f32 %v286_v4  ;;  %vm416_vm1 = vweird.f32 %v286_v4 }
 0x120   :  { %625 = vpow2.f32 %v484_v6 }
 0x124   :  { %v269_v7 = vpop.xlane.xlu1 %268 }
 0x125   :  { %v624_v8 = vpop.eup %623  ;;  %v287_v9 = vmax.f32 %v269_v7, 1e-12 }
 0x126   :  { %v411_v10 = vmul.f32 %v624_v8, %v286_v4  ;;  %v626_v11 = vpop.eup %625  ;;  %vm417_vm0 = vweird.f32 %v624_v8 }
 0x127   :  { %627 = vrsqrt.f32 %v287_v9  ;;  %620 = vpush %v626_v11  ;;  %vm418_vm2 = vmor %vm416_vm1, %vm417_vm0  ;;  %vm426_vm4 = vweird.f32 %v287_v9 }
 0x128   :  { %v412_v12 = vmul.f32 %v624_v8, %v411_v10 }
 0x12a   :  { %v413_v13 = vmul.f32 0.5, %v412_v12 }
 0x12c   :  { %v414_v14 = vsub.f32 1.5, %v413_v13  ;;  %v271_v15 = vpop.xlane.xlu0 %270 }
 0x12d   :  { %v628_v16 = vpop.eup %627  ;;  %v288_v17 = vmax.f32 %v271_v15, 1e-12 }
 0x12e   :  { %v421_v18 = vmul.f32 %v628_v16, %v287_v9  ;;  %v415_v19 = vmul.f32 %v624_v8, %v414_v14  ;;  %vm427_vm3 = vweird.f32 %v628_v16 }
 0x12f   :  { %629 = vrsqrt.f32 %v288_v17  ;;  %vm428_vm5 = vmor %vm426_vm4, %vm427_vm3  ;;  %vm436_vm7 = vweird.f32 %v288_v17 }
 0x130   :  { %v422_v21 = vmul.f32 %v628_v16, %v421_v18  ;;  %v419_v22 = vsel %vm418_vm2, %v624_v8, %v415_v19 }
 0x131   :  { %v846_v23 = vmul.f32 %v419_v22, %v755_v20 }
 0x132   :  { %v423_v24 = vmul.f32 0.5, %v422_v21 }
 0x133   :  { %478 = vst [vmem:[%s1153_s7 + $0x60] sm:$0xff] %v846_v23 }
 0x134   :  { %v424_v26 = vsub.f32 1.5, %v423_v24  ;;  %v273_v27 = vpop.xlane.xlu0 %272  ;;  %v261_v28 = vpop.xlane.xlu1 %260 }
 0x135   :  { %v630_v29 = vpop.eup %629  ;;  %v289_v31 = vmax.f32 %v273_v27, 1e-12  ;;  %v852_v32 = vmax.f32 %v261_v28, 1e-12 }
 0x136   :  { %v431_v33 = vmul.f32 %v630_v29, %v288_v17  ;;  %v425_v34 = vmul.f32 %v628_v16, %v424_v26  ;;  %vm437_vm6 = vweird.f32 %v630_v29 }
 0x137   :  { %631 = vrsqrt.f32 %v289_v31  ;;  %vm438_vm8 = vmor %vm436_vm7, %vm437_vm6  ;;  %vm446_vm10 = vweird.f32 %v289_v31  ;;  %vm386_vm11 = vweird.f32 %v852_v32 }
 0x138   :  { %v432_v20 = vmul.f32 %v630_v29, %v431_v33  ;;  %633 = vrsqrt.f32 %v852_v32  ;;  %v429_v37 = vsel %vm428_vm5, %v628_v16, %v425_v34 }
 0x139   :  { %v856_v38 = vmul.f32 %v429_v37, %v760_v25 }
 0x13a   :  { %v433_v39 = vmul.f32 0.5, %v432_v20 }
 0x13b   :  { %479 = vst [vmem:[%s1153_s7 + $0x68] sm:$0xff] %v856_v38  ;;  %v496_v22 = vpack.c.bf16 %v856_v38, %v846_v23 }
 0x13c   :  { %v434_v42 = vsub.f32 1.5, %v433_v39  ;;  %v263_v44 = vpop.xlane.xlu2 %262  ;;  %v259_v45 = vpop.xlane.xlu0 %258 }
 0x13d   :  { %v632_v46 = vpop.eup %631  ;;  %v862_v49 = vmax.f32 %v263_v44, 1e-12  ;;  %v864_v51 = vmax.f32 %v259_v45, 1e-12  ;;  %v251_v52 = vpop.xlane.xlu1 %250 }
 0x13e   :  { %v866_v53 = vpop.eup %633  ;;  %v441_v25 = vmul.f32 %v632_v46, %v289_v31  ;;  %v868_v57 = vmax.f32 %v251_v52, 1e-12  ;;  %v435_v58 = vmul.f32 %v630_v29, %v434_v42  ;;  %vm447_vm9 = vweird.f32 %v632_v46 }
 0x13f   :  { %v381_v59 = vmul.f32 %v866_v53, %v852_v32  ;;  %635 = vrsqrt.f32 %v862_v49  ;;  %vm448_vm12 = vmor %vm446_vm10, %vm447_vm9  ;;  %vm387_vm13 = vweird.f32 %v866_v53  ;;  %vm396_vm14 = vweird.f32 %v862_v49 }
 0x140   :  { %v442_v60 = vmul.f32 %v632_v46, %v441_v25  ;;  %637 = vrsqrt.f32 %v864_v51  ;;  %v439_v0 = vsel %vm438_vm8, %v630_v29, %v435_v58  ;;  %vm376_vm15 = vweird.f32 %v864_v51  ;;  %vm935_vm3 = vmor %vm386_vm11, %vm387_vm13 }
 0x141   :  { %v382_v63 = vmul.f32 %v866_v53, %v381_v59  ;;  %639 = vrsqrt.f32 %v868_v57  ;;  %v464_v3 = vmul.f32 %v439_v0, %v765_v30  ;;  %vm336_vm1 = vweird.f32 %v868_v57 }
 0x142   :  { %v443_v2 = vmul.f32 0.5, %v442_v60 }
 0x143   :  { %v383_v5 = vmul.f32 0.5, %v382_v63  ;;  %480 = vst [vmem:[%s1153_s7 + $0x70] sm:$0xff] %v464_v3 }
 0x144   :  { %v444_v4 = vsub.f32 1.5, %v443_v2  ;;  %v265_v6 = vpop.xlane.xlu2 %264  ;;  %v257_v7 = vpop.xlane.xlu0 %256 }
 0x145   :  { %v880_v8 = vpop.eup %635  ;;  %v882_v9 = vmax.f32 %v265_v6, 1e-12  ;;  %v884_v10 = vmax.f32 %v257_v7, 1e-12  ;;  %v249_v11 = vpop.xlane.xlu1 %248  ;;  %v384_v17 = vsub.f32 1.5, %v383_v5 }
 0x146   :  { %v886_v12 = vpop.eup %637  ;;  %v391_v30 = vmul.f32 %v880_v8, %v862_v49  ;;  %v890_v13 = vmax.f32 %v249_v11, 1e-12  ;;  %v445_v14 = vmul.f32 %v632_v46, %v444_v4  ;;  %vm397_vm0 = vweird.f32 %v880_v8 }
 0x147   :  { %v892_v15 = vpop.eup %639  ;;  %v371_v16 = vmul.f32 %v886_v12, %v864_v51  ;;  %641 = vrsqrt.f32 %v882_v9  ;;  %v385_v20 = vmul.f32 %v866_v53, %v384_v17  ;;  %vm377_vm2 = vweird.f32 %v886_v12  ;;  %vm398_vm6 = vmor %vm396_vm14, %vm397_vm0 }
 0x148   :  { %v392_v18 = vmul.f32 %v880_v8, %v391_v30  ;;  %v331_v19 = vmul.f32 %v892_v15, %v868_v57  ;;  %643 = vrsqrt.f32 %v884_v10  ;;  %v449_v27 = vsel %vm448_vm12, %v632_v46, %v445_v14  ;;  %vm968_vm7 = vmor %vm376_vm15, %vm377_vm2 }
 0x149   :  { %v372_v21 = vmul.f32 %v886_v12, %v371_v16  ;;  %645 = vrsqrt.f32 %v890_v13  ;;  %v465_v29 = vmul.f32 %v449_v27, %v773_v36  ;;  %vm337_vm4 = vweird.f32 %v892_v15 }
 0x14a   :  { %v393_v24 = vmul.f32 0.5, %v392_v18  ;;  %v332_v26 = vmul.f32 %v892_v15, %v331_v19  ;;  %vm406_vm5 = vweird.f32 %v882_v9  ;;  %v389_v2 = vsel %vm935_vm3, %v866_v53, %v385_v20  ;;  %vm1004_vm10 = vmor %vm336_vm1, %vm337_vm4 }
 0x14b   :  { %v373_v28 = vmul.f32 0.5, %v372_v21  ;;  %481 = vst [vmem:[%s1153_s7 + $0x78] sm:$0xff] %v465_v29  ;;  %v497_v36 = vpack.c.bf16 %v465_v29, %v464_v3  ;;  %vm366_vm8 = vweird.f32 %v884_v10  ;;  %vm326_vm11 = vweird.f32 %v890_v13 }
 0x14c   :  { %v394_v31 = vsub.f32 1.5, %v393_v24  ;;  %v255_v33 = vpop.xlane.xlu2 %254  ;;  %v247_v34 = vpop.xlane.xlu0 %246  ;;  %v333_v39 = vmul.f32 0.5, %v332_v26 }
 0x14d   :  { %v914_v37 = vpop.eup %641  ;;  %v916_v42 = vmax.f32 %v255_v33, 1e-12  ;;  %v918_v44 = vmax.f32 %v247_v34, 1e-12  ;;  %v374_v46 = vsub.f32 1.5, %v373_v28  ;;  %v27_v58 = vpop.xlane.xlu1 %26  ;;  %498 = vmatpush.bf16.xpose.msra.mxu1 %v497_v36 }
 0x14e   :  { %v923_v45 = vpop.eup %643  ;;  %v401_v52 = vmul.f32 %v914_v37, %v882_v9  ;;  %v395_v25 = vmul.f32 %v880_v8, %v394_v31  ;;  %v334_v3 = vsub.f32 1.5, %v333_v39  ;;  %v957_v6 = vmax.f32 %v27_v58, 1e-12 }
 0x14f   :  { %v929_v59 = vpop.eup %645  ;;  %v361_v63 = vmul.f32 %v923_v45, %v884_v10  ;;  %647 = vrsqrt.f32 %v916_v42  ;;  %v375_v30 = vmul.f32 %v886_v12, %v374_v46  ;;  %vm407_vm9 = vweird.f32 %v914_v37 }
 0x150   :  { %v402_v32 = vmul.f32 %v914_v37, %v401_v52  ;;  %v321_v0 = vmul.f32 %v929_v59, %v890_v13  ;;  %649 = vrsqrt.f32 %v918_v44  ;;  %v399_v5 = vsel %vm398_vm6, %v880_v8, %v395_v25  ;;  %vm408_vm12 = vmor %vm406_vm5, %vm407_vm9 }
 0x151   :  { %v362_v4 = vmul.f32 %v923_v45, %v361_v63  ;;  %v961_v11 = vmul.f32 %v399_v5, %v786_v43  ;;  %651 = vrsqrt.f32 %v957_v6  ;;  %v975_v8 = vmul.f32 %v389_v2, %v770_v35 }
 0x152   :  { %v403_v49 = vmul.f32 0.5, %v402_v32  ;;  %v322_v7 = vmul.f32 %v929_v59, %v321_v0  ;;  %v379_v51 = vsel %vm968_vm7, %v886_v12, %v375_v30  ;;  %v335_v29 = vmul.f32 %v892_v15, %v334_v3 }
 0x153   :  { %v363_v14 = vmul.f32 0.5, %v362_v4  ;;  %476 = vst [vmem:[%s1153_s7 + $0x50] sm:$0xff] %v961_v11  ;;  %v992_v26 = vmul.f32 %v379_v51, %v783_v41  ;;  %vm367_vm13 = vweird.f32 %v923_v45  ;;  %vm356_vm14 = vweird.f32 %v916_v42 }
 0x154   :  { %v404_v43 = vsub.f32 1.5, %v403_v49  ;;  %v323_v16 = vmul.f32 0.5, %v322_v7  ;;  %v253_v17 = vpop.xlane.xlu2 %252  ;;  %v245_v18 = vpop.xlane.xlu0 %244  ;;  %475 = vst [vmem:[%s1153_s7 + $0x48] sm:$0xff] %v975_v8  ;;  %vm327_vm15 = vweird.f32 %v929_v59  ;;  %vm368_vm0 = vmor %vm366_vm8, %vm367_vm13  ;;  %vm35_vm1 = vweird.f32 %v957_v6 }
 0x155   :  { %v985_v19 = vpop.eup %647  ;;  %v364_v21 = vsub.f32 1.5, %v363_v14  ;;  %v987_v35 = vmax.f32 %v253_v17, 1e-12  ;;  %v989_v24 = vmax.f32 %v245_v18, 1e-12  ;;  %499 = vmatpush.bf16.xpose.msra.mxu1 %v496_v22  ;;  %474 = vst [vmem:[%s1153_s7 + $0x40] sm:$0xff] %v992_v26  ;;  %vm1073_vm4 = vmor %vm326_vm11, %vm327_vm15  ;;  %vm316_vm7 = vweird.f32 %v918_v44 }
 0x156   :  { %v998_v27 = vpop.eup %649  ;;  %v351_v41 = vmul.f32 %v985_v19, %v916_v42  ;;  %v405_v28 = vmul.f32 %v914_v37, %v404_v43  ;;  %v324_v34 = vsub.f32 1.5, %v323_v16  ;;  %vm357_vm2 = vweird.f32 %v985_v19 }
 0x157   :  { %v311_v57 = vmul.f32 %v998_v27, %v918_v44  ;;  %653 = vrsqrt.f32 %v987_v35  ;;  %v1033_v33 = vpop.eup %651  ;;  %v365_v38 = vmul.f32 %v923_v45, %v364_v21  ;;  %vm317_vm3 = vweird.f32 %v998_v27  ;;  %vm358_vm6 = vmor %vm356_vm14, %vm357_vm2 }
 0x158   :  { %v352_v9 = vmul.f32 %v985_v19, %v351_v41  ;;  %655 = vrsqrt.f32 %v989_v24  ;;  %v409_v31 = vsel %vm408_vm12, %v914_v37, %v405_v28  ;;  %v30_v39 = vmul.f32 %v1033_v33, %v957_v6  ;;  %vm318_vm8 = vmor %vm316_vm7, %vm317_vm3  ;;  %s621_s16 = spop %620 }
 0x159   :  { %v312_v20 = vmul.f32 %v998_v27, %v311_v57  ;;  %v461_v23 = vmul.f32 %v409_v31, %v801_v50  ;;  %v339_v37 = vsel %vm1004_vm10, %v892_v15, %v335_v29  ;;  %v369_v10 = vsel %vm368_vm0, %v923_v45, %v365_v38 }
 0x15a   :  { %v353_v22 = vmul.f32 0.5, %v352_v9  ;;  %v1054_v46 = vmul.f32 %v339_v37, %v780_v40  ;;  %v31_v58 = vmul.f32 %v1033_v33, %v30_v39  ;;  %v1059_v15 = vmul.f32 %v369_v10, %v798_v48 }
 0x15b   :  { %v313_v36 = vmul.f32 0.5, %v312_v20  ;;  %477 = vst [vmem:[%s1153_s7 + $0x58] sm:$0xff] %v461_v23  ;;  %v495_v50 = vpack.c.bf16 %v461_v23, %v961_v11  ;;  %v325_v40 = vmul.f32 %v929_v59, %v324_v34  ;;  %vm36_vm5 = vweird.f32 %v1033_v33 }
 0x15c   :  { %v354_v52 = vsub.f32 1.5, %v353_v22  ;;  %v243_v25 = vpop.xlane.xlu2 %242  ;;  %470 = vst [vmem:[%s1153_s7 + $0x20] sm:$0xff] %v1054_v46  ;;  %v32_v2 = vmul.f32 0.5, %v31_v58  ;;  %vm1097_vm9 = vmor %vm35_vm1, %vm36_vm5  ;;  %vm346_vm12 = vweird.f32 %v987_v35  ;;  %vm306_vm14 = vweird.f32 %v989_v24 }
 0x15d   :  { %v654_v60 = vpop.eup %653  ;;  %v314_v63 = vsub.f32 1.5, %v313_v36  ;;  %v1062_v32 = vmax.f32 %v243_v25, 1e-12  ;;  %473 = vst [vmem:[%s1153_s7 + $0x38] sm:$0xff] %v1059_v15  ;;  %500 = vmatpush.bf16.xpose.msra.mxu1 %v495_v50  ;;  %v329_v30 = vsel %vm1073_vm4, %v929_v59, %v325_v40  ;;  %v487_v31 = vstv %s621_s16 }
 0x15e   :  { %v656_v45 = vpop.eup %655  ;;  %v341_v0 = vmul.f32 %v654_v60, %v987_v35  ;;  %v355_v3 = vmul.f32 %v985_v19, %v354_v52  ;;  %v33_v5 = vsub.f32 1.5, %v32_v2  ;;  %v453_v16 = vmul.f32 %v329_v30, %v795_v47 }
 0x15f   :  { %v301_v13 = vmul.f32 %v656_v45, %v989_v24  ;;  %657 = vrsqrt.f32 %v1062_v32  ;;  %v315_v7 = vmul.f32 %v998_v27, %v314_v63  ;;  %vm347_vm10 = vweird.f32 %v654_v60 }
 0x160   :  { %v342_v4 = vmul.f32 %v654_v60, %v341_v0  ;;  %v359_v49 = vsel %vm358_vm6, %v985_v19, %v355_v3  ;;  %v34_v14 = vmul.f32 %v1033_v33, %v33_v5  ;;  %469 = vst [vmem:[%s1153_s7 + $0x18] sm:$0xff] %v453_v16  ;;  %vm307_vm11 = vweird.f32 %v656_v45  ;;  %vm348_vm13 = vmor %vm346_vm12, %vm347_vm10 }
 0x161   :  { %v302_v11 = vmul.f32 %v656_v45, %v301_v13  ;;  %v456_v44 = vmul.f32 %v359_v49, %v810_v54  ;;  %v319_v43 = vsel %vm318_vm8, %v998_v27, %v315_v7  ;;  %v494_v47 = vpack.c.bf16 %v975_v8, %v992_v26  ;;  %vm308_vm15 = vmor %vm306_vm14, %vm307_vm11 }
 0x162   :  { %v343_v53 = vmul.f32 0.5, %v342_v4  ;;  %v452_v6 = vmul.f32 %v319_v43, %v813_v55  ;;  %v38_v54 = vsel %vm1097_vm9, %v1033_v33, %v34_v14  ;;  %vm296_vm1 = vweird.f32 %v1062_v32 }
 0x163   :  { %v303_v17 = vmul.f32 0.5, %v302_v11  ;;  %472 = vst [vmem:[%s1153_s7 + $0x30] sm:$0xff] %v456_v44  ;;  %v39_v19 = vmul.f32 %v38_v54, %v818_v56  ;;  %v493_v28 = vpack.c.bf16 %v1059_v15, %v456_v44 }
 0x164   :  { %v344_v18 = vsub.f32 1.5, %v343_v53  ;;  %468 = vst [vmem:[%s1153_s7 + $0x10] sm:$0xff] %v452_v6  ;;  %v491_v9 = vpack.c.bf16 %v453_v16, %v452_v6 }
 0x165   :  { %v658_v59 = vpop.eup %657  ;;  %v304_v51 = vsub.f32 1.5, %v303_v17  ;;  %501 = vmatpush.bf16.xpose.msra.mxu1 %v494_v47  ;;  %44 = vst [vmem:[%s1154_s6] sm:$0xff] %v39_v19  ;;  %v488_v34 = vmul.f32 %v487_v31, %v39_v19 }
 0x166   :  { %v291_v55 = vmul.f32 %v658_v59, %v1062_v32  ;;  %v345_v21 = vmul.f32 %v654_v60, %v344_v18  ;;  %vm297_vm0 = vweird.f32 %v658_v59 }
 0x167   :  { %v305_v8 = vmul.f32 %v656_v45, %v304_v51  ;;  %vm298_vm2 = vmor %vm296_vm1, %vm297_vm0  ;;  %v489_v20 = vpack.c.bf16 %v488_v34, %v488_v34 }
 0x168   :  { %v292_v56 = vmul.f32 %v658_v59, %v291_v55  ;;  %v349_v26 = vsel %vm348_vm13, %v654_v60, %v345_v21 }
 0x169   :  { %v455_v27 = vmul.f32 %v349_v26, %v827_v61  ;;  %v309_v12 = vsel %vm308_vm15, %v656_v45, %v305_v8 }
 0x16a   :  { %v293_v41 = vmul.f32 0.5, %v292_v56  ;;  %v451_v35 = vmul.f32 %v309_v12, %v830_v62 }
 0x16b   :  { %471 = vst [vmem:[%s1153_s7 + $0x28] sm:$0xff] %v455_v27  ;;  %v492_v57 = vpack.c.bf16 %v455_v27, %v1054_v46 }
 0x16c   :  { %v294_v24 = vsub.f32 1.5, %v293_v41  ;;  %467 = vst [vmem:[%s1153_s7 + $0x8] sm:$0xff] %v451_v35 }
 0x16d   :  { %502 = vmatpush.bf16.xpose.msra.mxu1 %v493_v28 }
 0x16e   :  { %v295_v29 = vmul.f32 %v658_v59, %v294_v24 }
 0x170   :  { %v299_v61 = vsel %vm298_vm2, %v658_v59, %v295_v29 }
 0x171   :  { %v450_v62 = vmul.f32 %v299_v61, %v838_v1 }
 0x173   :  { %466 = vst [vmem:[%s1153_s7] sm:$0xff] %v450_v62  ;;  %v490_v33 = vpack.c.bf16 %v451_v35, %v450_v62 }
 0x175   :  { %503 = vmatpush.bf16.xpose.msra.mxu1 %v492_v57 }
 0x17d   :  { %504 = vmatpush.bf16.xpose.msra.mxu1 %v491_v9 }
 0x185   :  { %505 = vmatpush.bf16.xpose.msra.mxu1 %v490_v33 }
 0x18c   :  { %506 = vmatmul.bf16.vlgmr.msra.gmra.mxu1 %v489_v20 }
 0x209   :  { %v507_v23 = vpop.f32.mrf.mxu1 }
 0x20a   :  { %511 = vst [vmem:[%s1155_s5] sm:$0xff] %v507_v23 }
 0x211   :  { %v509_v1 = vpop.f32.mrf.mxu1 }

// kernel: forward.2
= control target key start
LH: loop header
LB: loop body
LE: loop exit
PB: predicated region body
PF: predicated region fallthrough
CT: control target
= control target key end

     0   :  { %8 = vsyncpa [#allocation3], 0  ;;  %s1038_s15 = smov [#allocation2]   ;;  %s1039_s17 = smov 64   ;;  %s1082_s0 = inlined_call_operand.vmem [shape: bf16[8,1024], index: 0, kind: input, shape index: {}]   ;;  %s1083_s1 = inlined_call_operand.hbm [shape: bf16[1024,128], index: 1, kind: input, shape index: {}]   ;;  %s1084_s2 = inlined_call_operand.vmem [shape: f32[1,128], index: 2, kind: input, shape index: {}]   ;;  %s1085_s3 = inlined_call_operand.vmem [shape: f32[8,128], index: 3, kind: output, shape index: {}]  }
   0x1   :  { %s15_s14 = sshll.u32 %s1083_s1, 4  ;;  %s17_s16 = sshll.u32 %s1038_s15, 4  ;;  %s16_s14 = int_to_ptr.hbm [resolvable:$true] %s15_s14  ;;  %s18_s16 = int_to_ptr.vmem [resolvable:$true] %s17_s16 }
   0x2   :  { %s1040_s18 = smov 4  }
   0x3   :  { %23 = dma.hbm_to_vmem [thread:$0]  %s16_s14, 8192, %s18_s16, [#allocation3], %s1039_s17, %s1039_s17, %s1040_s18  }
   0x4   :  { %1036 = dma.done.wait [#allocation3], 8192  }
   0x5   :  { %1037 = vsyncadd [#allocation3], 4294959104  ;;  %v951_v0 = vld [vmem:[#allocation2 + $0x38] sm:$0xff]  ;;  %v950_v4 = vld [vmem:[#allocation2 + $0x30] sm:$0xff] }
   0x6   :  { %v959_v1 = vld [vmem:[#allocation2 + $0x78] sm:$0xff]  ;;  %578 = vmatpush.bf16.msra.mxu0 %v951_v0  ;;  %v958_v5 = vld [vmem:[#allocation2 + $0x70] sm:$0xff]  ;;  %v949_v8 = vld [vmem:[#allocation2 + $0x28] sm:$0xff] }
   0x7   :  { %v967_v2 = vld [vmem:[#allocation2 + $0xb8] sm:$0xff]  ;;  %591 = vmatpush.bf16.msra.mxu1 %v959_v1  ;;  %v966_v6 = vld [vmem:[#allocation2 + $0xb0] sm:$0xff]  ;;  %v957_v9 = vld [vmem:[#allocation2 + $0x68] sm:$0xff] }
   0x8   :  { %v975_v3 = vld [vmem:[#allocation2 + $0xf8] sm:$0xff]  ;;  %604 = vmatpush.bf16.msra.mxu2 %v967_v2  ;;  %v974_v7 = vld [vmem:[#allocation2 + $0xf0] sm:$0xff]  ;;  %v965_v10 = vld [vmem:[#allocation2 + $0xa8] sm:$0xff] }
   0x9   :  { %617 = vmatpush.bf16.msra.mxu3 %v975_v3  ;;  %v973_v11 = vld [vmem:[#allocation2 + $0xe8] sm:$0xff]  ;;  %v948_v12 = vld [vmem:[#allocation2 + $0x20] sm:$0xff]  ;;  %v947_v16 = vld [vmem:[#allocation2 + $0x18] sm:$0xff] }
   0xa   :  { %579 = vmatpush.bf16.msra.mxu0 %v950_v4  ;;  %v956_v13 = vld [vmem:[#allocation2 + $0x60] sm:$0xff]  ;;  %v955_v17 = vld [vmem:[#allocation2 + $0x58] sm:$0xff]  ;;  %v946_v20 = vld [vmem:[#allocation2 + $0x10] sm:$0xff] }
   0xb   :  { %592 = vmatpush.bf16.msra.mxu1 %v958_v5  ;;  %v964_v14 = vld [vmem:[#allocation2 + $0xa0] sm:$0xff]  ;;  %v963_v18 = vld [vmem:[#allocation2 + $0x98] sm:$0xff]  ;;  %v954_v21 = vld [vmem:[#allocation2 + $0x50] sm:$0xff] }
   0xc   :  { %605 = vmatpush.bf16.msra.mxu2 %v966_v6  ;;  %v972_v15 = vld [vmem:[#allocation2 + $0xe0] sm:$0xff]  ;;  %v971_v19 = vld [vmem:[#allocation2 + $0xd8] sm:$0xff]  ;;  %v962_v22 = vld [vmem:[#allocation2 + $0x90] sm:$0xff] }
   0xd   :  { %618 = vmatpush.bf16.msra.mxu3 %v974_v7  ;;  %v970_v23 = vld [vmem:[#allocation2 + $0xd0] sm:$0xff]  ;;  %v945_v24 = vld [vmem:[#allocation2 + $0x8] sm:$0xff]  ;;  %v30_v29 = vld [vmem:[%s1082_s0] sm:$0xff] }
   0xe   :  { %580 = vmatpush.bf16.msra.mxu0 %v949_v8  ;;  %v953_v25 = vld [vmem:[#allocation2 + $0x48] sm:$0xff]  ;;  %v944_v30 = vld [vmem:[#allocation2] sm:$0xff]  ;;  %v170_v36 = vunpack.c.l.b16 %v30_v29  ;;  %v171_v37 = vunpack.c.h.b16 %v30_v29  ;;  %v983_v38 = vld [vmem:[#allocation2 + $0x138] sm:$0xff] }
   0xf   :  { %593 = vmatpush.bf16.msra.mxu1 %v957_v9  ;;  %v961_v26 = vld [vmem:[#allocation2 + $0x88] sm:$0xff]  ;;  %v952_v31 = vld [vmem:[#allocation2 + $0x40] sm:$0xff]  ;;  %v991_v39 = vld [vmem:[#allocation2 + $0x178] sm:$0xff] }
  0x10   :  { %606 = vmatpush.bf16.msra.mxu2 %v965_v10  ;;  %v969_v27 = vld [vmem:[#allocation2 + $0xc8] sm:$0xff]  ;;  %v960_v34 = vld [vmem:[#allocation2 + $0x80] sm:$0xff]  ;;  %v999_v40 = vld [vmem:[#allocation2 + $0x1b8] sm:$0xff]  ;;  %v178_v44 = vpack.c.b16 %v170_v36, %v170_v36  ;;  %v179_v45 = vpack.c.b16 %v171_v37, %v171_v37 }
  0x11   :  { %619 = vmatpush.bf16.msra.mxu3 %v973_v11  ;;  %v31_v28 = vld [vmem:[%s1082_s0 + $0x8] sm:$0xff]  ;;  %v968_v35 = vld [vmem:[#allocation2 + $0xc0] sm:$0xff]  ;;  %v1007_v41 = vld [vmem:[#allocation2 + $0x1f8] sm:$0xff] }
  0x12   :  { %581 = vmatpush.bf16.msra.mxu0 %v948_v12  ;;  %v172_v32 = vunpack.c.l.b16 %v31_v28  ;;  %v173_v33 = vunpack.c.h.b16 %v31_v28  ;;  %v982_v46 = vld [vmem:[#allocation2 + $0x130] sm:$0xff]  ;;  %v981_v50 = vld [vmem:[#allocation2 + $0x128] sm:$0xff]  ;;  %v980_v54 = vld [vmem:[#allocation2 + $0x120] sm:$0xff] }
  0x13   :  { %594 = vmatpush.bf16.msra.mxu1 %v956_v13  ;;  %v990_v47 = vld [vmem:[#allocation2 + $0x170] sm:$0xff]  ;;  %v989_v51 = vld [vmem:[#allocation2 + $0x168] sm:$0xff]  ;;  %v988_v55 = vld [vmem:[#allocation2 + $0x160] sm:$0xff] }
  0x14   :  { %607 = vmatpush.bf16.msra.mxu2 %v964_v14  ;;  %v180_v42 = vpack.c.b16 %v172_v32, %v172_v32  ;;  %v181_v43 = vpack.c.b16 %v173_v33, %v173_v33  ;;  %v998_v48 = vld [vmem:[#allocation2 + $0x1b0] sm:$0xff]  ;;  %v997_v52 = vld [vmem:[#allocation2 + $0x1a8] sm:$0xff]  ;;  %v996_v56 = vld [vmem:[#allocation2 + $0x1a0] sm:$0xff] }
  0x15   :  { %620 = vmatpush.bf16.msra.mxu3 %v972_v15  ;;  %v1006_v49 = vld [vmem:[#allocation2 + $0x1f0] sm:$0xff]  ;;  %v1005_v53 = vld [vmem:[#allocation2 + $0x1e8] sm:$0xff]  ;;  %v1004_v57 = vld [vmem:[#allocation2 + $0x1e0] sm:$0xff] }
  0x16   :  { %582 = vmatpush.bf16.msra.mxu0 %v947_v16  ;;  %v979_v58 = vld [vmem:[#allocation2 + $0x118] sm:$0xff]  ;;  %v978_v62 = vld [vmem:[#allocation2 + $0x110] sm:$0xff]  ;;  %v977_v2 = vld [vmem:[#allocation2 + $0x108] sm:$0xff] }
  0x17   :  { %595 = vmatpush.bf16.msra.mxu1 %v955_v17  ;;  %v987_v59 = vld [vmem:[#allocation2 + $0x158] sm:$0xff]  ;;  %v986_v63 = vld [vmem:[#allocation2 + $0x150] sm:$0xff]  ;;  %v985_v3 = vld [vmem:[#allocation2 + $0x148] sm:$0xff] }
  0x18   :  { %608 = vmatpush.bf16.msra.mxu2 %v963_v18  ;;  %v995_v60 = vld [vmem:[#allocation2 + $0x198] sm:$0xff]  ;;  %v994_v0 = vld [vmem:[#allocation2 + $0x190] sm:$0xff]  ;;  %v993_v5 = vld [vmem:[#allocation2 + $0x188] sm:$0xff] }
  0x19   :  { %621 = vmatpush.bf16.msra.mxu3 %v971_v19  ;;  %v1003_v61 = vld [vmem:[#allocation2 + $0x1d8] sm:$0xff]  ;;  %v1002_v1 = vld [vmem:[#allocation2 + $0x1d0] sm:$0xff]  ;;  %v1001_v6 = vld [vmem:[#allocation2 + $0x1c8] sm:$0xff] }
  0x1a   :  { %583 = vmatpush.bf16.msra.mxu0 %v946_v20  ;;  %v32_v4 = vld [vmem:[%s1082_s0 + $0x10] sm:$0xff]  ;;  %v33_v7 = vld [vmem:[%s1082_s0 + $0x18] sm:$0xff]  ;;  %v976_v10 = vld [vmem:[#allocation2 + $0x100] sm:$0xff] }
  0x1b   :  { %596 = vmatpush.bf16.msra.mxu1 %v954_v21  ;;  %v174_v8 = vunpack.c.l.b16 %v32_v4  ;;  %v175_v9 = vunpack.c.h.b16 %v32_v4  ;;  %v984_v11 = vld [vmem:[#allocation2 + $0x140] sm:$0xff]  ;;  %v176_v12 = vunpack.c.l.b16 %v33_v7  ;;  %v177_v13 = vunpack.c.h.b16 %v33_v7 }
  0x1c   :  { %609 = vmatpush.bf16.msra.mxu2 %v962_v22  ;;  %v992_v14 = vld [vmem:[#allocation2 + $0x180] sm:$0xff] }
  0x1d   :  { %622 = vmatpush.bf16.msra.mxu3 %v970_v23  ;;  %v1000_v15 = vld [vmem:[#allocation2 + $0x1c0] sm:$0xff]  ;;  %v182_v16 = vpack.c.b16 %v174_v8, %v174_v8  ;;  %v183_v17 = vpack.c.b16 %v175_v9, %v175_v9  ;;  %v184_v18 = vpack.c.b16 %v176_v12, %v176_v12  ;;  %v185_v19 = vpack.c.b16 %v177_v13, %v177_v13 }
  0x1e   :  { %584 = vmatpush.bf16.msra.mxu0 %v945_v24 }
  0x1f   :  { %597 = vmatpush.bf16.msra.mxu1 %v953_v25 }
  0x20   :  { %610 = vmatpush.bf16.msra.mxu2 %v961_v26  ;;  %v1011_v26 = vld [vmem:[%s1084_s2] ss:$0 sm:$0xff] }
  0x21   :  { %623 = vmatpush.bf16.msra.mxu3 %v969_v27 }
  0x22   :  { %585 = vmatpush.bf16.msra.mxu0 %v944_v30 }
  0x23   :  { %598 = vmatpush.bf16.msra.mxu1 %v952_v31 }
  0x24   :  { %611 = vmatpush.bf16.msra.mxu2 %v960_v34 }
  0x25   :  { %624 = vmatpush.bf16.msra.mxu3 %v968_v35  ;;  %586 = vmatmul.bf16.vlgmr.msra.gmra.mxu0 %v178_v44 }
  0x26   :  { %630 = vmatpush.bf16.msrb.mxu0 %v983_v38  ;;  %599 = vmatmul.bf16.vlgmr.msra.gmra.mxu1 %v179_v45 }
  0x27   :  { %643 = vmatpush.bf16.msrb.mxu1 %v991_v39  ;;  %612 = vmatmul.bf16.vlgmr.msra.gmra.mxu2 %v180_v42 }
  0x28   :  { %656 = vmatpush.bf16.msrb.mxu2 %v999_v40  ;;  %625 = vmatmul.bf16.vlgmr.msra.gmra.mxu3 %v181_v43 }
  0x29   :  { %669 = vmatpush.bf16.msrb.mxu3 %v1007_v41 }
  0x2a   :  { %631 = vmatpush.bf16.msrb.mxu0 %v982_v46 }
  0x2b   :  { %644 = vmatpush.bf16.msrb.mxu1 %v990_v47 }
  0x2c   :  { %657 = vmatpush.bf16.msrb.mxu2 %v998_v48 }
  0x2d   :  { %670 = vmatpush.bf16.msrb.mxu3 %v1006_v49 }
  0x2e   :  { %632 = vmatpush.bf16.msrb.mxu0 %v981_v50 }
  0x2f   :  { %645 = vmatpush.bf16.msrb.mxu1 %v989_v51 }
  0x30   :  { %658 = vmatpush.bf16.msrb.mxu2 %v997_v52 }
  0x31   :  { %671 = vmatpush.bf16.msrb.mxu3 %v1005_v53 }
  0x32   :  { %633 = vmatpush.bf16.msrb.mxu0 %v980_v54 }
  0x33   :  { %646 = vmatpush.bf16.msrb.mxu1 %v988_v55 }
  0x34   :  { %659 = vmatpush.bf16.msrb.mxu2 %v996_v56 }
  0x35   :  { %672 = vmatpush.bf16.msrb.mxu3 %v1004_v57 }
  0x36   :  { %634 = vmatpush.bf16.msrb.mxu0 %v979_v58 }
  0x37   :  { %647 = vmatpush.bf16.msrb.mxu1 %v987_v59 }
  0x38   :  { %660 = vmatpush.bf16.msrb.mxu2 %v995_v60 }
  0x39   :  { %673 = vmatpush.bf16.msrb.mxu3 %v1003_v61 }
  0x3a   :  { %635 = vmatpush.bf16.msrb.mxu0 %v978_v62 }
  0x3b   :  { %648 = vmatpush.bf16.msrb.mxu1 %v986_v63 }
  0x3c   :  { %661 = vmatpush.bf16.msrb.mxu2 %v994_v0 }
  0x3d   :  { %674 = vmatpush.bf16.msrb.mxu3 %v1002_v1 }
  0x3e   :  { %636 = vmatpush.bf16.msrb.mxu0 %v977_v2 }
  0x3f   :  { %649 = vmatpush.bf16.msrb.mxu1 %v985_v3 }
  0x40   :  { %662 = vmatpush.bf16.msrb.mxu2 %v993_v5 }
  0x41   :  { %675 = vmatpush.bf16.msrb.mxu3 %v1001_v6 }
  0x42   :  { %637 = vmatpush.bf16.msrb.mxu0 %v976_v10 }
  0x43   :  { %650 = vmatpush.bf16.msrb.mxu1 %v984_v11 }
  0x44   :  { %663 = vmatpush.bf16.msrb.mxu2 %v992_v14 }
  0x45   :  { %676 = vmatpush.bf16.msrb.mxu3 %v1000_v15  ;;  %638 = vmatmul.bf16.vlgmr.msrb.gmra.mxu0 %v182_v16 }
  0x46   :  { %651 = vmatmul.bf16.vlgmr.msrb.gmra.mxu1 %v183_v17 }
  0x47   :  { %664 = vmatmul.bf16.vlgmr.msrb.gmra.mxu2 %v184_v18 }
  0x48   :  { %677 = vmatmul.bf16.vlgmr.msrb.gmra.mxu3 %v185_v19 }
  0xa2   :  { %v587_v20 = vpop.f32.mrf.mxu0 }
  0xa3   :  { %v600_v21 = vpop.f32.mrf.mxu1  ;;  %v588_v29 = vadd.f32 %v1011_v26, %v587_v20 }
  0xa5   :  { %v601_v30 = vadd.f32 %v600_v21, %v588_v29 }
  0xaa   :  { %v613_v22 = vpop.f32.mrf.mxu2  ;;  %v589_v24 = vpop.f32.mrf.mxu0 }
  0xab   :  { %v626_v23 = vpop.f32.mrf.mxu3  ;;  %v602_v25 = vpop.f32.mrf.mxu1  ;;  %v614_v31 = vadd.f32 %v613_v22, %v601_v30 }
  0xad   :  { %v627_v32 = vadd.f32 %v626_v23, %v614_v31 }
  0xb2   :  { %v615_v27 = vpop.f32.mrf.mxu2 }
  0xb3   :  { %v628_v28 = vpop.f32.mrf.mxu3 }
  0xc2   :  { %v639_v33 = vpop.f32.mrf.mxu0 }
  0xc3   :  { %v652_v34 = vpop.f32.mrf.mxu1  ;;  %v640_v35 = vadd.f32 %v639_v33, %v627_v32 }
  0xc5   :  { %v653_v36 = vadd.f32 %v652_v34, %v640_v35 }
  0xca   :  { %v665_v37 = vpop.f32.mrf.mxu2  ;;  %v641_v40 = vpop.f32.mrf.mxu0 }
  0xcb   :  { %v678_v38 = vpop.f32.mrf.mxu3  ;;  %v666_v39 = vadd.f32 %v665_v37, %v653_v36  ;;  %v654_v41 = vpop.f32.mrf.mxu1 }
  0xcd   :  { %v679_v42 = vadd.f32 %v678_v38, %v666_v39 }
  0xcf   :  { %682 = vst [vmem:[%s1085_s3] sm:$0xff] %v679_v42 }
  0xd2   :  { %v667_v43 = vpop.f32.mrf.mxu2 }
  0xd3   :  { %v680_v44 = vpop.f32.mrf.mxu3 }
  0xd4   :  { %687 = vsyncpa [#allocation3], 1 }

</bundles_post_ra>
